<compile_context>
chip_gen: v6e
topology: v6e:2x2x1
jax: 0.10.0
libtpu: 0.0.40
codegen_flags: <defaults>
</compile_context>

<pallas_src>
import functools

import jax
import jax.numpy as jnp
from jax.experimental import pallas as pl
from jax.experimental.pallas import tpu as pltpu


# ------------------------------- helpers ------------------------------------


def _round_up(x, n):
    return ((x + n - 1) // n) * n


def _cdiv(a, b):
    return (a + b - 1) // b


# sublane packing of the second-to-last dim, keyed by dtype itemsize
_SUBLANE_PACK = {4: 8, 2: 16, 1: 32}


def _block_spec(block_shape, index_map, single_buffer=False):
    """BlockSpec; resident (fetched-once) blocks request a single VMEM buffer."""
    if single_buffer and hasattr(pl, "Buffered"):
        try:
            return pl.BlockSpec(block_shape, index_map,
                                pipeline_mode=pl.Buffered(1))
        except TypeError:
            pass
    return pl.BlockSpec(block_shape, index_map)


def _vmem_budget():
    """(budget_for_tiling, vmem_limit_cap) derived from the chip generation."""
    try:
        phys = int(pltpu.get_tpu_info().vmem_capacity_bytes)
    except Exception:
        phys = 64 << 20  # conservative (v7x per-TC) fallback
    budget = max(32 << 20, phys - (16 << 20))   # 112 MiB v5e/v6e, 48 MiB v7x
    cap = max(32 << 20, phys - (8 << 20))       # 120 MiB v5e/v6e, 56 MiB v7x
    return budget, cap


# ----------------------------- Pallas kernel --------------------------------


def _lora_kernel(*refs, has_mid, has_bias):
    """Grid point (i, j): o[i, j] = h(i) @ up_t[:, j] [+ bias[j]].

    h(i) = (x[i] @ down_t) [@ mid_t] is computed once per M tile (j == 0)
    into the VMEM scratch and reused for all N tiles.
    """
    it = iter(refs)
    x_ref = next(it)
    down_ref = next(it)
    mid_ref = next(it) if has_mid else None
    up_ref = next(it)
    bias_ref = next(it) if has_bias else None
    o_ref = next(it)
    h_ref = next(it)  # VMEM scratch (tm, rp)

    cdt = down_ref.dtype  # compute dtype: bf16 weights ride the bf16 MXU path

    @pl.when(pl.program_id(1) == 0)
    def _():
        h = jnp.dot(x_ref[...].astype(cdt), down_ref[...],
                    preferred_element_type=jnp.float32).astype(cdt)
        if has_mid:
            h = jnp.dot(h, mid_ref[...],
                        preferred_element_type=jnp.float32).astype(cdt)
        h_ref[...] = h

    y = jnp.dot(h_ref[...], up_ref[...], preferred_element_type=jnp.float32)
    if has_bias:
        y = y + bias_ref[...].astype(jnp.float32)
    o_ref[...] = y.astype(o_ref.dtype)


# --------------------------- weight preparation ------------------------------


def prepare_lora_weights(down, up, *, mid=None, bias=None, alpha=None,
                         weight=1.0):
    """One-time (per weight set) padding / transpose / scale folding.

    down: (rank, in_features)   mid: (rank, rank) or None
    up:   (out_features, rank)  bias: (out_features,) or None
    """
    rank, in_features = down.shape
    out_features = up.shape[0]
    wdt = down.dtype
    # scale() in the LoRA layer: alpha / rank (1.0 if alpha is None)
    scale = float(weight) * (float(alpha) / rank if alpha is not None else 1.0)

    rp = _round_up(max(rank, 1), 128)  # lane-dense intermediate
    down_t = jnp.zeros((in_features, rp), wdt).at[:, :rank].set(
        down.T.astype(wdt))
    # Fold the scalar scale into up / bias -> no per-tile epilogue multiply.
    up_t = jnp.zeros((rp, out_features), wdt).at[:rank, :].set(
        (up.T.astype(jnp.float32) * scale).astype(wdt))
    mid_t = None
    if mid is not None:
        mid_t = jnp.zeros((rp, rp), wdt).at[:rank, :rank].set(
            mid.T.astype(wdt))
    bias_row = None
    if bias is not None:
        bias_row = (bias.astype(jnp.float32) * scale).reshape(1, out_features)

    return dict(down_t=down_t, mid_t=mid_t, up_t=up_t, bias_row=bias_row,
                rank=rank, rp=rp,
                in_features=in_features, out_features=out_features)


# ------------------------------- wrapper -------------------------------------


def lora_linear_sidecar_prepared(x, prep, *, tm_target=512, tn_floor=2048):
    """Run the LoRA sidecar forward with pre-prepared (cached) weights."""
    in_features = prep["in_features"]
    out_features = prep["out_features"]
    rp = prep["rp"]
    down_t, mid_t = prep["down_t"], prep["mid_t"]
    up_t, bias_row = prep["up_t"], prep["bias_row"]
    has_mid = mid_t is not None
    has_bias = bias_row is not None
    wdt = down_t.dtype

    orig_shape = x.shape
    m = 1
    for d in orig_shape[:-1]:
        m *= d
    if m == 0:
        return jnp.zeros(orig_shape[:-1] + (out_features,), x.dtype)
    x2 = x.reshape(m, in_features)

    xsize = jnp.dtype(x.dtype).itemsize
    wsize = jnp.dtype(wdt).itemsize
    pack = _SUBLANE_PACK.get(xsize, 8)

    budget, vmem_cap = _vmem_budget()

    def vmem_needed(tm, tn):
        # down / mid: resident, single-buffered
        w = (in_features * rp + (rp * rp if has_mid else 0)) * wsize
        if tn == out_features:  # up / bias resident, single-buffered
            w += rp * out_features * wsize
            w += out_features * 4 if has_bias else 0
        else:                   # up / bias streamed per N tile, double-buffered
            w += 2 * rp * tn * wsize
            w += 2 * tn * 4 if has_bias else 0
        act = 2 * tm * in_features * xsize   # x double-buffer
        outb = 2 * tm * tn * xsize           # out double-buffer
        scratch = tm * rp * wsize            # h scratch
        return w + act + outb + scratch

    # ---- tile selection: split N first (keeps TM large), then shrink TM.
    tm = tm_target
    tn = out_features
    while (vmem_needed(tm, tn) > budget and tn % 256 == 0
           and tn // 2 >= tn_floor):
        tn //= 2
    while tm > pack and vmem_needed(tm, tn) > budget:
        tm //= 2

    # Align TM to the dtype's sublane pack and balance the M grid so there are
    # at least 2 (roughly equal) M tiles whenever possible (v7x megacore).
    m_aligned = _round_up(m, pack)
    tm = max(pack, min(tm, m_aligned))
    if m_aligned >= 2 * pack:
        half = _round_up(_cdiv(m, 2), pack)
        if tm > half:
            tm = half

    grid_m = _cdiv(m, tm)
    grid_n = _cdiv(out_features, tn)
    nj = grid_n

    # ---- specs (no host-side padding of x / slicing of y: cdiv grids + masked
    #      boundary blocks handle ragged M and N).
    in_specs = [
        pl.BlockSpec((tm, in_features), lambda i, j: (i, 0)),
        _block_spec((in_features, rp), lambda i, j: (0, 0), single_buffer=True),
    ]
    args = [x2, down_t]
    if has_mid:
        in_specs.append(
            _block_spec((rp, rp), lambda i, j: (0, 0), single_buffer=True))
        args.append(mid_t)
    in_specs.append(
        _block_spec((rp, tn), lambda i, j: (0, j), single_buffer=(nj == 1)))
    args.append(up_t)
    if has_bias:
        in_specs.append(
            _block_spec((1, tn), lambda i, j: (0, j), single_buffer=(nj == 1)))
        args.append(bias_row)

    out_specs = pl.BlockSpec((tm, tn), lambda i, j: (i, j))
    scratch_shapes = [pltpu.VMEM((tm, rp), wdt)]

    vmem_limit = int(min(vmem_cap,
                         max(32 << 20, vmem_needed(tm, tn) + (4 << 20))))

    kernel = functools.partial(_lora_kernel, has_mid=has_mid, has_bias=has_bias)

    y2 = pl.pallas_call(
        kernel,
        out_shape=jax.ShapeDtypeStruct((m, out_features), x.dtype),
        grid=(grid_m, grid_n),
        in_specs=in_specs,
        out_specs=out_specs,
        scratch_shapes=scratch_shapes,
        compiler_params=pltpu.CompilerParams(
            dimension_semantics=("parallel", "arbitrary"),
            vmem_limit_bytes=vmem_limit,
        ),
    )(*args)

    return y2.reshape(orig_shape[:-1] + (out_features,))


def lora_linear_sidecar(x, down, up, *, mid=None, bias=None, alpha=None,
                        weight=1.0, tm_target=512):
    """Convenience wrapper (prepares weights per call; prefer caching `prep`)."""
    prep = prepare_lora_weights(down, up, mid=mid, bias=bias, alpha=alpha,
                                weight=weight)
    return lora_linear_sidecar_prepared(x, prep, tm_target=tm_target)


# ------------------------------ reference -----------------------------------


def lora_linear_sidecar_ref(x, down, up, *, mid=None, bias=None,
                            alpha=None, weight=1.0):
    rank = down.shape[0]
    h = x @ down.T
    if mid is not None:
        h = h @ mid.T
    y = h @ up.T
    if bias is not None:
        y = y + bias
    scale = float(alpha) / rank if alpha is not None else 1.0
    return y * (weight * scale)


# -------------------------------- main ---------------------------------------


if __name__ == "__main__":
    key = jax.random.PRNGKey(0)
    k1, k2, k3, k4, k5, k6 = jax.random.split(key, 6)

    batch, seq = 2, 8
    in_features, rank, out_features = 32, 8, 32
    alpha = 4.0            # scale() = alpha / rank = 0.5
    weight = 0.75

    x = jax.random.normal(k1, (batch, seq, in_features), dtype=jnp.float32)
    down = jax.random.normal(k2, (rank, in_features), dtype=jnp.float32) * 0.1
    mid = jax.random.normal(k3, (rank, rank), dtype=jnp.float32) * 0.1
    up = jax.random.normal(k4, (out_features, rank), dtype=jnp.float32) * 0.1
    bias = jax.random.normal(k5, (out_features,), dtype=jnp.float32) * 0.1

    # Full path (down -> mid -> up + bias); weights prepared once and reused.
    prep = prepare_lora_weights(down, up, mid=mid, bias=bias,
                                alpha=alpha, weight=weight)
    y = jax.block_until_ready(lora_linear_sidecar_prepared(x, prep))
    y_ref = lora_linear_sidecar_ref(x, down, up, mid=mid, bias=bias,
                                    alpha=alpha, weight=weight)
    assert jnp.allclose(y, y_ref, atol=1e-5, rtol=1e-5)

    # Ragged token count (m = 2*7 = 14, not a multiple of 8), same prepared weights.
    x_ragged = jax.random.normal(k6, (batch, 7, in_features), dtype=jnp.float32)
    y_r = jax.block_until_ready(lora_linear_sidecar_prepared(x_ragged, prep))
    y_r_ref = lora_linear_sidecar_ref(x_ragged, down, up, mid=mid, bias=bias,
                                      alpha=alpha, weight=weight)
    assert jnp.allclose(y_r, y_r_ref, atol=1e-5, rtol=1e-5)

    # No-mid / no-bias branch (mirrors `if self._lora_layer.mid is not None`).
    y2 = jax.block_until_ready(
        lora_linear_sidecar(x, down, up, alpha=alpha, weight=weight))
    y2_ref = lora_linear_sidecar_ref(x, down, up, alpha=alpha, weight=weight)
    assert jnp.allclose(y2, y2_ref, atol=1e-5, rtol=1e-5)

    # bf16 fast path (activations + LoRA weights), loose tolerance vs f32 ref.
    xb = x.astype(jnp.bfloat16)
    db, mb = down.astype(jnp.bfloat16), mid.astype(jnp.bfloat16)
    ub, bb = up.astype(jnp.bfloat16), bias.astype(jnp.bfloat16)
    yb = jax.block_until_ready(
        lora_linear_sidecar(xb, db, ub, mid=mb, bias=bb,
                            alpha=alpha, weight=weight))
    yb_ref = lora_linear_sidecar_ref(
        xb.astype(jnp.float32), db.astype(jnp.float32), ub.astype(jnp.float32),
        mid=mb.astype(jnp.float32), bias=bb.astype(jnp.float32),
        alpha=alpha, weight=weight)
    assert jnp.allclose(yb.astype(jnp.float32), yb_ref, atol=5e-2, rtol=5e-2)

    print("KERNEL_OK")
</pallas_src>

<mosaic_0001>
module attributes {stable_mosaic.version = 11 : i64} {
  func.func @_lora_kernel(%arg0: i32, %arg1: i32, %arg2: memref<8x32xf32, #tpu.memory_space<vmem>>, %arg3: memref<32x128xf32, #tpu.memory_space<vmem>>, %arg4: memref<128x128xf32, #tpu.memory_space<vmem>>, %arg5: memref<128x32xf32, #tpu.memory_space<vmem>>, %arg6: memref<1x32xf32, #tpu.memory_space<vmem>>, %arg7: memref<8x32xf32, #tpu.memory_space<vmem>>, %arg8: memref<8x128xf32, #tpu.memory_space<vmem>>) attributes {dimension_semantics = [#tpu.dimension_semantics<parallel>, #tpu.dimension_semantics<arbitrary>], iteration_bounds = array<i64: 2, 1>, scalar_prefetch = 0 : i64, scratch_operands = 1 : i64, tpu.core_type = #tpu.core_type<tc>, window_params = [{transform_indices = @transform_0, window_bounds = array<i64: 8, 32>}, {pipeline_mode = #tpu.pipeline_mode<synchronous>, transform_indices = @transform_1, window_bounds = array<i64: 32, 128>}, {pipeline_mode = #tpu.pipeline_mode<synchronous>, transform_indices = @transform_2, window_bounds = array<i64: 128, 128>}, {pipeline_mode = #tpu.pipeline_mode<synchronous>, transform_indices = @transform_3, window_bounds = array<i64: 128, 32>}, {pipeline_mode = #tpu.pipeline_mode<synchronous>, transform_indices = @transform_4, window_bounds = array<i64: 1, 32>}, {transform_indices = @transform_5, window_bounds = array<i64: 8, 32>}]} {
    %c0_i32 = arith.constant 0 : i32
    %0 = arith.cmpi eq, %arg1, %c0_i32 : i32
    %1 = arith.extui %0 : i1 to i32
    %c0_i32_0 = arith.constant 0 : i32
    %2 = arith.cmpi ne, %1, %c0_i32_0 : i32
    scf.if %2 {
      %c0_8 = arith.constant 0 : index
      %c0_9 = arith.constant 0 : index
      %10 = vector.load %arg2[%c0_8, %c0_9] : memref<8x32xf32, #tpu.memory_space<vmem>>, vector<8x32xf32>
      %c0_10 = arith.constant 0 : index
      %c0_11 = arith.constant 0 : index
      %11 = vector.load %arg3[%c0_10, %c0_11] : memref<32x128xf32, #tpu.memory_space<vmem>>, vector<32x128xf32>
      %cst_12 = arith.constant dense<0.000000e+00> : vector<8x128xf32>
      %12 = tpu.matmul %10, %11, %cst_12 {dimension_numbers = #tpu.dot_dimension_numbers<[1], [0], [0], [1], [0, 0, 1, 1], [], []>} : vector<8x32xf32>, vector<32x128xf32>, vector<8x128xf32> -> vector<8x128xf32>
      %c0_13 = arith.constant 0 : index
      %c0_14 = arith.constant 0 : index
      %13 = vector.load %arg4[%c0_13, %c0_14] : memref<128x128xf32, #tpu.memory_space<vmem>>, vector<128x128xf32>
      %cst_15 = arith.constant dense<0.000000e+00> : vector<8x128xf32>
      %14 = tpu.matmul %12, %13, %cst_15 {dimension_numbers = #tpu.dot_dimension_numbers<[1], [0], [0], [1], [0, 0, 1, 1], [], []>} : vector<8x128xf32>, vector<128x128xf32>, vector<8x128xf32> -> vector<8x128xf32>
      %c0_16 = arith.constant 0 : index
      %c0_17 = arith.constant 0 : index
      %15 = vector.load %arg8[%c0_16, %c0_17] : memref<8x128xf32, #tpu.memory_space<vmem>>, vector<8x128xf32>
      tpu.vector_store %arg8[%c0_16, %c0_17], %14 {strides = array<i32>} : memref<8x128xf32, #tpu.memory_space<vmem>>, vector<8x128xf32>,
    } else {
    }
    %c0 = arith.constant 0 : index
    %c0_1 = arith.constant 0 : index
    %3 = vector.load %arg8[%c0, %c0_1] : memref<8x128xf32, #tpu.memory_space<vmem>>, vector<8x128xf32>
    %c0_2 = arith.constant 0 : index
    %c0_3 = arith.constant 0 : index
    %4 = vector.load %arg5[%c0_2, %c0_3] : memref<128x32xf32, #tpu.memory_space<vmem>>, vector<128x32xf32>
    %cst = arith.constant dense<0.000000e+00> : vector<8x32xf32>
    %5 = tpu.matmul %3, %4, %cst {dimension_numbers = #tpu.dot_dimension_numbers<[1], [0], [0], [1], [0, 0, 1, 1], [], []>} : vector<8x128xf32>, vector<128x32xf32>, vector<8x32xf32> -> vector<8x32xf32>
    %c0_4 = arith.constant 0 : index
    %c0_5 = arith.constant 0 : index
    %6 = vector.load %arg6[%c0_4, %c0_5] : memref<1x32xf32, #tpu.memory_space<vmem>>, vector<1x32xf32>
    %7 = vector.broadcast %6 : vector<1x32xf32> to vector<8x32xf32>
    %8 = arith.addf %5, %7 : vector<8x32xf32>
    %c0_6 = arith.constant 0 : index
    %c0_7 = arith.constant 0 : index
    %9 = vector.load %arg7[%c0_6, %c0_7] : memref<8x32xf32, #tpu.memory_space<vmem>>, vector<8x32xf32>
    tpu.vector_store %arg7[%c0_6, %c0_7], %8 {strides = array<i32>} : memref<8x32xf32, #tpu.memory_space<vmem>>, vector<8x32xf32>,
    return
  }
  func.func @transform_0(%arg0: i32, %arg1: i32) -> (i32, i32) {
    %c0_i32 = arith.constant 0 : i32
    %c0_i32_0 = arith.constant 0 : i32
    return %arg0, %c0_i32 : i32, i32
  }
  func.func @transform_1(%arg0: i32, %arg1: i32) -> (i32, i32) {
    %c0_i32 = arith.constant 0 : i32
    %c0_i32_0 = arith.constant 0 : i32
    %c0_i32_1 = arith.constant 0 : i32
    return %c0_i32, %c0_i32_0 : i32, i32
  }
  func.func @transform_2(%arg0: i32, %arg1: i32) -> (i32, i32) {
    %c0_i32 = arith.constant 0 : i32
    %c0_i32_0 = arith.constant 0 : i32
    %c0_i32_1 = arith.constant 0 : i32
    return %c0_i32, %c0_i32_0 : i32, i32
  }
  func.func @transform_3(%arg0: i32, %arg1: i32) -> (i32, i32) {
    %c0_i32 = arith.constant 0 : i32
    %c0_i32_0 = arith.constant 0 : i32
    return %c0_i32, %arg1 : i32, i32
  }
  func.func @transform_4(%arg0: i32, %arg1: i32) -> (i32, i32) {
    %c0_i32 = arith.constant 0 : i32
    %c0_i32_0 = arith.constant 0 : i32
    return %c0_i32, %arg1 : i32, i32
  }
  func.func @transform_5(%arg0: i32, %arg1: i32) -> (i32, i32) {
    %c0_i32 = arith.constant 0 : i32
    return %arg0, %arg1 : i32, i32
  }
}

</mosaic_0001>

<bundles_post_ra>
// kernel: tpu_custom_call.1
= control target key start
LH: loop header
LB: loop body
LE: loop exit
PB: predicated region body
PF: predicated region fallthrough
CT: control target
= control target key end

     0   :  { %10 = vsyncpa [#allocation4], 0  ;;  %s1316_s0 = inlined_call_operand.hbm [shape: f32[16,32], index: 0, kind: input, shape index: {}]   ;;  %s1317_s1 = inlined_call_operand.vmem [shape: f32[32,128], index: 1, kind: input, shape index: {}]   ;;  %s1318_s2 = inlined_call_operand.vmem [shape: f32[128,128], index: 2, kind: input, shape index: {}]   ;;  %s1319_s3 = inlined_call_operand.vmem [shape: f32[128,32], index: 3, kind: input, shape index: {}]   ;;  %s1320_s4 = inlined_call_operand.vmem [shape: f32[1,32], index: 4, kind: input, shape index: {}]   ;;  %s1321_s5 = inlined_call_operand.hbm [shape: f32[16,32], index: 5, kind: output, shape index: {}]  }
   0x1   :  { %12 = vsyncpa [#allocation4 + $0x1], 0 }
   0x2   :  { %13 = vsyncpa [#allocation5], 0 }
   0x3   :  { %15 = vsyncpa [#allocation5 + $0x1], 0  ;;  %s1017_s18 = smov 0   ;;  %s1019_s19 = smov 0  }
   0x4   :  { %s1021_s20 = smov 0   ;;  %s1023_s21 = smov 0  }
   0x5   :  { %s1025_s22 = smov 0   ;;  %s1027_s23 = smov 0  }
   0x6 LB: > { %s672_s24 = sadd.s32 4294967295, %s981_s23   ;;  %s673_s25 = sadd.s32 4294967294, %s981_s23   ;;  %s981_s23 = sphi %s1027_s23, %s21_s23   ;;  %s977_s22 = sphi %s1025_s22, %s1333_s22   ;;  %s973_s21 = sphi %s1023_s21, %s1332_s21   ;;  %s969_s20 = sphi %s1021_s20, %s1331_s20   ;;  %s965_s19 = sphi %s1019_s19, %s1330_s19   ;;  %s961_s18 = sphi %s1017_s18, %s1329_s18  }
   0x7   : > { %s33_s26 = sadd.s32 1, %s977_s22  ;;  %s40_s27 = sadd.s32 1, %s969_s20 }
   0x8   : > { %p35_p0 = scmp.ge.s32.totalorder %s33_s26, 2  ;;  %p47_p1 = scmp.ne.s32.totalorder %s969_s20, %s965_s19 }
   0x9   : > { %p48_p2 = scmp.eq.s32.totalorder %s981_s23, 0  ;;  %p53_p3 = scmp.ne.s32.totalorder %s965_s19, %s961_s18 }
   0xa   : > { %s1335_s26 = smov (%p35_p0, %s33_s26), 0  ;;  %p54_p5 = scmp.eq.s32.totalorder %s672_s24, 0 }
   0xb   : > { %p1058_p4 = por %p48_p2, %p47_p1  ;;  %s37_s29 = ssub.s32 %s977_s22, %s1335_s26 }
   0xc   : > { %p173_p6 = scmp.eq.s32.totalorder %s672_s24, 1  ;;  %p38_p7 = scmp.eq.s32.totalorder %s37_s29, 0 }
   0xd   : > { %p1064_p8 = por %p54_p5, %p53_p3  ;;  %p179_p10 = scmp.eq.s32.totalorder %s673_s25, 1 }
   0xe   : > { %p1068_p9 = por %p173_p6, %p47_p1  ;;  %p821_p13 = scmp.lt.s32.totalorder %s981_s23, 2 }
   0xf   : > { %s1073_s7 = scalar_select %p38_p7, %s969_s20, %s40_s27  }
  0x10   : > { %p1075_p11 = por %p179_p10, %p53_p3  ;;  %s218_s9 = sand.u32 1, %s969_s20  }
  0x11   : > { %s678_s10 = sshll.u32 %s218_s9, 3  ;;  %s679_s11 = sshll.u32 %s977_s22, 7 }
  0x12   : > { %s1325_s8 = scalar_select %p1075_p11, 1, 0 }
  0x13   : > { %s227_s14 = scalar_lea.hbm %s1316_s0, %s679_s11  ;;  %s222_s15 = scalar_lea.vmem [#allocation3], %s678_s10 }
  0x14   : > { %s229_s16 = sshll.u32 %s222_s15, 4  ;;  %p1088_p0 = pnand %p821_p13, %p1058_p4  ;;  %s230_s16 = int_to_ptr.vmem [resolvable:$true] %s229_s16 }
  0x15   : > { %p680_p1 = scmp.ge.s32.totalorder %s981_s23, 1  ;;  %p234_p2 = scmp.lt.s32.totalorder %s981_s23, 3 }
  0x16   : > { %s219_s24 = scalar_lea.sflag [#allocation4], %s218_s9  ;;  %p875_p3 = pneg %p1088_p0 }
  0x17   : > { %s886_s25 = scalar_lea.vmem %s230_s16, 128  ;;  %s983_s27 = smov [#allocation3]  }
  0x18   : > { %p887_p5 = scmp.ne.s32.totalorder %s230_s16, %s886_s25  ;;  %s891_s29 = sshll.u32 %s983_s27, 4  ;;  %s892_s29 = int_to_ptr.vmem [resolvable:$false] %s891_s29 }
  0x19   : > { %s893_s10 = scalar_lea.vmem %s892_s29, 256  ;;  %p894_p10 = scmp.lt.s32.totalorder %s230_s16, %s892_s29 }
  0x1a   : > { %p889_p6 = pnand %p887_p5, %p875_p3  ;;  %p895_p12 = scmp.lt.s32.totalorder %s893_s10, %s886_s25 }
  0x1c   : > { %p890_p7 = pneg %p889_p6  ;;  %p896_p4 = por %p895_p12, %p894_p10 }
  0x1e   : > { %p897_p13 = pnand %p896_p4, %p890_p7 }
  0x20   : > { %900 = shalt.err (!%p897_p13)
}
  0x21   : > { %816 = dma.hbm_to_vmem [thread:$0]  (!%p1088_p0), %s227_s14, 128, %s230_s16, %s219_s24  }
  0x22   : > { %p235_p11 = pnand %p680_p1, %p234_p2 }
  0x23   : > { %s1103_s28 = sand.u32 (!%p235_p11), 1, %s965_s19  }
  0x24   : > { %238 = sbr.rel (%p235_p11) target bundleno = 646 (0x286), region = 40  ;;  %s681_s9 = sshll.u32 (!%p235_p11), %s1103_s28, 3 }
  0x25   : > { %s241_s11 = scalar_lea.sflag (!%p235_p11), [#allocation4], %s1103_s28  ;;  %s244_s12 = scalar_lea.vmem (!%p235_p11), [#allocation3], %s681_s9 }
  0x29   : > { %952 = dma.done.wait (%p1064_p8), %s241_s11, 128  }
  0x2a   : > { %954 = vsyncadd (%p1064_p8), %s241_s11, 4294967168  ;;  %v984_v0 = vmov 0.0   ;;  %vm985_vm0 = vmmov 0   ;;  %v293_v1 = vld [vmem:[%s1317_s1 + $0x18] sm:$0xff]  ;;  %v292_v2 = vld [vmem:[%s1317_s1 + $0x10] sm:$0xff]  ;;  %vm294_vm1 = vcmask 261120  }
  0x2b   : > { %728 = vmatprep.subr.mxu0 %v984_v0  ;;  %736 = vmatprep.mubr.msk.f32.mxu0 %vm985_vm0, %v984_v0  ;;  %v383_v3 = vld [vmem:[%s1318_s2 + $0x78] sm:$0xff]  ;;  %v291_v4 = vld [vmem:[%s1317_s1 + $0x8] sm:$0xff]  ;;  %v382_v5 = vld [vmem:[%s1318_s2 + $0x70] sm:$0xff]  ;;  %s686_s29 = sshll.u32 %s973_s21, 7  ;;  %s277_s10 = scalar_lea.vmem [#allocation6], %s681_s9 }
  0x2c   : > { %739 = vmatprep.subr.mxu1 %v984_v0  ;;  %771 = vmatprep.mubr.msk.f32.mxu1 %vm985_vm0, %v984_v0  ;;  %v381_v6 = vld [vmem:[%s1318_s2 + $0x68] sm:$0xff]  ;;  %v290_v7 = vld [vmem:[%s1317_s1] sm:$0xff]  ;;  %v379_v10 = vld [vmem:[%s1318_s2 + $0x58] sm:$0xff]  ;;  %s566_s11 = sshll.u32 %s277_s10, 4  ;;  %s1273_s15 = scalar_lea.hbm %s1321_s5, %s686_s29  ;;  %s567_s11 = int_to_ptr.vmem [resolvable:$true] %s566_s11 }
  0x2d   : > { %729 = vmatpush3.msra.mxu0 %v293_v1  ;;  %740 = vmatpush3.msra.mxu1 %v383_v3  ;;  %v289_v8 = vld [vmem:[%s244_s12] sm:$0xff]  ;;  %v378_v11 = vld [vmem:[%s1318_s2 + $0x50] sm:$0xff]  ;;  %v375_v14 = vld [vmem:[%s1318_s2 + $0x38] sm:$0xff]  ;;  %s552_s16 = scalar_lea.sflag [#allocation5], %s1103_s28  ;;  %s901_s30 = scalar_lea.vmem %s567_s11, 128 }
  0x2e   : > { %730 = vmatprep.subr.mxu0 %v984_v0  ;;  %741 = vmatprep.subr.mxu1 %v984_v0  ;;  %v380_v9 = vld [vmem:[%s1318_s2 + $0x60] sm:$0xff]  ;;  %v377_v12 = vld [vmem:[%s1318_s2 + $0x48] sm:$0xff]  ;;  %v374_v15 = vld [vmem:[%s1318_s2 + $0x30] sm:$0xff]  ;;  %p902_p8 = scmp.ne.s32.totalorder %s567_s11, %s901_s30  ;;  %s986_s21 = smov [#allocation6]  }
  0x2f   : > { %731 = vmatpush3.msra.mxu0 %v292_v2  ;;  %742 = vmatpush3.msra.mxu1 %v382_v5  ;;  %v376_v13 = vld [vmem:[%s1318_s2 + $0x40] sm:$0xff]  ;;  %v373_v16 = vld [vmem:[%s1318_s2 + $0x28] sm:$0xff]  ;;  %v371_v18 = vld [vmem:[%s1318_s2 + $0x18] sm:$0xff]  ;;  %s905_s9 = sshll.u32 %s986_s21, 4  ;;  %s906_s9 = int_to_ptr.vmem [resolvable:$false] %s905_s9 }
  0x30   : > { %732 = vmatprep.subr.mxu0 %v984_v0  ;;  %743 = vmatprep.subr.mxu1 %v984_v0  ;;  %v372_v17 = vld [vmem:[%s1318_s2 + $0x20] sm:$0xff]  ;;  %v370_v19 = vld [vmem:[%s1318_s2 + $0x10] sm:$0xff]  ;;  %v369_v20 = vld [vmem:[%s1318_s2 + $0x8] sm:$0xff]  ;;  %p903_p11 = pnand %p902_p8, %p1068_p9  ;;  %s907_s17 = scalar_lea.vmem %s906_s9, 256 }
  0x31   : > { %733 = vmatpush3.msra.mxu0 %v291_v4  ;;  %744 = vmatpush3.msra.mxu1 %v381_v6  ;;  %v368_v21 = vld [vmem:[%s1318_s2] sm:$0xff]  ;;  %v471_v22 = vld [vmem:[%s1319_s3 + $0x78] sm:$0xff]  ;;  %v470_v23 = vld [vmem:[%s1319_s3 + $0x70] sm:$0xff]  ;;  %p908_p0 = scmp.lt.s32.totalorder %s567_s11, %s906_s9  ;;  %p909_p1 = scmp.lt.s32.totalorder %s907_s17, %s901_s30 }
  0x32   : > { %734 = vmatprep.subr.mxu0 %v984_v0  ;;  %745 = vmatprep.subr.mxu1 %v984_v0  ;;  %v469_v24 = vld [vmem:[%s1319_s3 + $0x68] sm:$0xff]  ;;  %v468_v25 = vld [vmem:[%s1319_s3 + $0x60] sm:$0xff]  ;;  %v467_v26 = vld [vmem:[%s1319_s3 + $0x58] sm:$0xff]  ;;  %p904_p12 = pneg %p903_p11 }
  0x33   : > { %735 = vmatpush3.msra.mxu0 %v290_v7  ;;  %746 = vmatpush3.msra.mxu1 %v380_v9  ;;  %v466_v27 = vld [vmem:[%s1319_s3 + $0x50] sm:$0xff]  ;;  %v465_v28 = vld [vmem:[%s1319_s3 + $0x48] sm:$0xff]  ;;  %v464_v29 = vld [vmem:[%s1319_s3 + $0x40] sm:$0xff]  ;;  %p910_p2 = por %p909_p1, %p908_p0 }
  0x34   : > { %737 = vmatmul.mubr.msk.f32.vlgmr.msra.gmra.mxu0 %vm294_vm1, %v289_v8  ;;  %747 = vmatprep.subr.mxu1 %v984_v0  ;;  %v463_v30 = vld [vmem:[%s1319_s3 + $0x38] sm:$0xff]  ;;  %v462_v31 = vld [vmem:[%s1319_s3 + $0x30] sm:$0xff]  ;;  %v461_v32 = vld [vmem:[%s1319_s3 + $0x28] sm:$0xff] }
  0x35   : > { %774 = vmatprep.subr.mxu0 %v984_v0  ;;  %748 = vmatpush3.msra.mxu1 %v379_v10  ;;  %v460_v33 = vld [vmem:[%s1319_s3 + $0x20] sm:$0xff]  ;;  %v459_v34 = vld [vmem:[%s1319_s3 + $0x18] sm:$0xff]  ;;  %v458_v35 = vld [vmem:[%s1319_s3 + $0x10] sm:$0xff]  ;;  %p911_p3 = pnand %p910_p2, %p904_p12 }
  0x36   : > { %806 = vmatprep.mubr.msk.f32.mxu0 %vm985_vm0, %v984_v0  ;;  %749 = vmatprep.subr.mxu1 %v984_v0  ;;  %v457_v36 = vld [vmem:[%s1319_s3 + $0x8] sm:$0xff]  ;;  %v456_v39 = vld [vmem:[%s1319_s3] sm:$0xff] }
  0x37   : > { %750 = vmatpush3.msra.mxu1 %v378_v11  ;;  %775 = vmatpush3.msra.mxu0 %v471_v22  ;;  %v684_v42 = vld [vmem:[%s1320_s4] ss:$0 sm:$0xff] }
  0x38   : > { %751 = vmatprep.subr.mxu1 %v984_v0  ;;  %776 = vmatprep.subr.mxu0 %v984_v0 }
  0x39   : > { %752 = vmatpush3.msra.mxu1 %v377_v12  ;;  %777 = vmatpush3.msra.mxu0 %v470_v23 }
  0x3a   : > { %753 = vmatprep.subr.mxu1 %v984_v0  ;;  %778 = vmatprep.subr.mxu0 %v984_v0 }
  0x3b   : > { %754 = vmatpush3.msra.mxu1 %v376_v13  ;;  %779 = vmatpush3.msra.mxu0 %v469_v24 }
  0x3c   : > { %755 = vmatprep.subr.mxu1 %v984_v0  ;;  %780 = vmatprep.subr.mxu0 %v984_v0 }
  0x3d   : > { %756 = vmatpush3.msra.mxu1 %v375_v14  ;;  %781 = vmatpush3.msra.mxu0 %v468_v25 }
  0x3e   : > { %757 = vmatprep.subr.mxu1 %v984_v0  ;;  %782 = vmatprep.subr.mxu0 %v984_v0 }
  0x3f   : > { %758 = vmatpush3.msra.mxu1 %v374_v15  ;;  %783 = vmatpush3.msra.mxu0 %v467_v26 }
  0x40   : > { %759 = vmatprep.subr.mxu1 %v984_v0  ;;  %784 = vmatprep.subr.mxu0 %v984_v0 }
  0x41   : > { %760 = vmatpush3.msra.mxu1 %v373_v16  ;;  %785 = vmatpush3.msra.mxu0 %v466_v27 }
  0x42   : > { %761 = vmatprep.subr.mxu1 %v984_v0  ;;  %786 = vmatprep.subr.mxu0 %v984_v0 }
  0x43   : > { %762 = vmatpush3.msra.mxu1 %v372_v17  ;;  %787 = vmatpush3.msra.mxu0 %v465_v28 }
  0x44   : > { %763 = vmatprep.subr.mxu1 %v984_v0  ;;  %788 = vmatprep.subr.mxu0 %v984_v0 }
  0x45   : > { %764 = vmatpush3.msra.mxu1 %v371_v18  ;;  %789 = vmatpush3.msra.mxu0 %v464_v29 }
  0x46   : > { %765 = vmatprep.subr.mxu1 %v984_v0  ;;  %790 = vmatprep.subr.mxu0 %v984_v0 }
  0x47   : > { %766 = vmatpush3.msra.mxu1 %v370_v19  ;;  %791 = vmatpush3.msra.mxu0 %v463_v30 }
  0x48   : > { %767 = vmatprep.subr.mxu1 %v984_v0  ;;  %792 = vmatprep.subr.mxu0 %v984_v0 }
  0x49   : > { %768 = vmatpush3.msra.mxu1 %v369_v20  ;;  %793 = vmatpush3.msra.mxu0 %v462_v31 }
  0x4a   : > { %769 = vmatprep.subr.mxu1 %v984_v0  ;;  %794 = vmatprep.subr.mxu0 %v984_v0 }
  0x4b   : > { %770 = vmatpush3.msra.mxu1 %v368_v21  ;;  %795 = vmatpush3.msra.mxu0 %v461_v32 }
  0x4c   : > { %796 = vmatprep.subr.mxu0 %v984_v0 }
  0x4d   : > { %797 = vmatpush3.msra.mxu0 %v460_v33 }
  0x4e   : > { %798 = vmatprep.subr.mxu0 %v984_v0 }
  0x4f   : > { %799 = vmatpush3.msra.mxu0 %v459_v34 }
  0x50   : > { %800 = vmatprep.subr.mxu0 %v984_v0 }
  0x51   : > { %801 = vmatpush3.msra.mxu0 %v458_v35 }
  0x52   : > { %802 = vmatprep.subr.mxu0 %v984_v0 }
  0x53   : > { %803 = vmatpush3.msra.mxu0 %v457_v36 }
  0x54   : > { %804 = vmatprep.subr.mxu0 %v984_v0 }
  0x55   : > { %805 = vmatpush3.msra.mxu0 %v456_v39 }
  0xf4   : > { %v364_v37 = vpop.f32.mrf.mxu0 }
  0xf5   : > { %772 = vmatmul.mubr.f32.vlgmr.msra.gmra.mxu1 %v364_v37 }
  0xf6   : > { %v738_v38 = vpop.f32.mrf.mxu0 }
 0x1b5   : > { %v450_v40 = vpop.f32.mrf.mxu1 }
 0x1b6   : > { %807 = vmatmul.mubr.f32.vlgmr.msra.gmra.mxu0 %v450_v40 }
 0x1b7   : > { %v773_v41 = vpop.f32.mrf.mxu1 }
 0x276   : > { %v545_v43 = vpop.f32.mrf.mxu0 }
 0x277   : > { %v546_v44 = vadd.f32 %v684_v42, %v545_v43 }
 0x278   : > { %v808_v45 = vpop.f32.mrf.mxu0 }
 0x279   : > { %550 = vst.msk [vmem:[%s277_s10] sm:$0xff] %vm294_vm1, %v546_v44 }
 0x27a   : > { %914 = shalt.err (!%p911_p3)
}
 0x27b   : > { %s915_s12 = scalar_lea.hbm %s1273_s15, 128  ;;  %s919_s25 = scalar_lea.hbm %s1321_s5, 256 }
 0x27c   : > { %p916_p5 = scmp.ne.s32.totalorder %s1273_s15, %s915_s12  ;;  %p920_p10 = scmp.lt.s32.totalorder %s1273_s15, %s1321_s5 }
 0x27d   : > { %p921_p4 = scmp.lt.s32.totalorder %s919_s25, %s915_s12 }
 0x27e   : > { %p917_p6 = pnand %p916_p5, %p1068_p9 }
 0x27f   : > { %p922_p13 = por %p921_p4, %p920_p10 }
 0x280   : > { %p918_p7 = pneg %p917_p6 }
 0x282   : > { %p923_p8 = pnand %p922_p13, %p918_p7 }
 0x284   : > { %926 = shalt.err (!%p923_p8)
}
 0x285   : > { %811 = dma.vmem_to_hbm [thread:$0]  (%p1068_p9), %s567_s11, 128, %s1273_s15, %s552_s16  }
 0x286 PF: > { %s578_s10 = sand.u32 1, %s961_s18   ;;  %p1327_p11 = scmp.ne.s32.totalorder %s1325_s8, 0 }
 0x287   : > { %p1328_p12 = scmp.ge.s32.totalorder %s981_s23, 2  ;;  %s579_s13 = scalar_lea.sflag [#allocation5], %s578_s10 }
 0x289   : > { %p818_p0 = pnand %p1328_p12, %p1327_p11 }
 0x28b   : > { %p819_p1 = pneg %p818_p0 }
 0x28d   : > { %956 = dma.done.wait (%p819_p1), %s579_s13, 128  }
 0x28e   : > { %958 = vsyncadd (%p819_p1), %s579_s13, 4294967168  ;;  %s21_s23 = sadd.s32 1, %s981_s23   ;;  %s1329_s18 = smov %s965_s19 }
 0x28f   : > { %p18_p2 = scmp.ge.s32.totalorder %s21_s23, 4   ;;  %s1330_s19 = smov %s969_s20 }
 0x290   : > { %s1331_s20 = smov %s1073_s7  ;;  %s1332_s21 = smov %s977_s22 }
 0x291   : > { %s1333_s22 = smov %s1335_s26  ;;  %20 = sbr.rel (!%p18_p2) target bundleno = 6 (0x6), region = 95 }
 0x296   :  { %584 = vsyncpa [#allocation4], 1 }
 0x297   :  { %586 = vsyncpa [#allocation4 + $0x1], 1 }
 0x298   :  { %587 = vsyncpa [#allocation5], 1 }
 0x299   :  { %589 = vsyncpa [#allocation5 + $0x1], 1 }

</bundles_post_ra>
